<compile_context>
chip_gen: v6e
topology: v6e:2x2x1
jax: 0.10.0
libtpu: 0.0.40
codegen_flags: <defaults>
</compile_context>

<pallas_src>
import jax
import jax.numpy as jnp
from jax.experimental import pallas as pl
from jax.experimental.pallas import tpu as pltpu

_LANES = 128  # vreg lane width


def _round_up(a, b):
    return (a + b - 1) // b * b


def logistic_regression_kernel(w_ref, b_ref, x_ref, o_ref):
    # w_ref/b_ref: (1,) f32 scalars in SMEM (scalar path; broadcast is free in the VPU op).
    # x_ref/o_ref: (blk, 128) f32 lane-dense VMEM tiles (unmasked full-lane stores).
    w = w_ref[0]
    b = b_ref[0]
    o_ref[...] = jax.nn.sigmoid(x_ref[...] * w + b)


def logistic_regression(x, weight, bias, *, block_rows=4096, min_kernel_elems=65536):
    """x: (N, 1) f32; weight: (1, 1) f32 (PyTorch Linear.weight layout); bias: (1,) f32."""
    N = x.shape[0]
    x = x.astype(jnp.float32)
    w = jnp.asarray(weight, jnp.float32).reshape(1)  # scalar weight
    b = jnp.asarray(bias, jnp.float32).reshape(1)    # scalar bias

    # Small-N fast path: fused XLA elementwise beats any kernel launch / layout plumbing.
    if N < min_kernel_elems:
        return jax.nn.sigmoid(x * w[0] + b[0]).reshape(N, 1)

    x_flat = x.reshape(-1)                 # metadata-only
    rows = pl.cdiv(N, _LANES)
    aligned = (N % _LANES) == 0
    if aligned:
        x2d = x_flat.reshape(rows, _LANES)  # metadata-only: no pad, no extra HBM pass
    else:
        # TODO(synk): the ragged tail (<128 elems) costs one pad copy of x and one slice
        # copy of y; XLA cannot alias a prefix slice into a custom-call operand.
        x2d = jnp.pad(x_flat, (0, rows * _LANES - N)).reshape(rows, _LANES)

    # Row-block size: multiple of 8 sublanes, capped at block_rows, and chosen so there
    # are >=2 blocks whenever rows > 8 (lets v7x shard the grid across its 2 TCs).
    if rows <= 8:
        blk = rows                                  # single full-extent block
    else:
        blk = min(block_rows, _round_up(pl.cdiv(rows, 2), 8))
    grid = pl.cdiv(rows, blk)                       # last block may be a partial boundary block

    y2d = pl.pallas_call(
        logistic_regression_kernel,
        out_shape=jax.ShapeDtypeStruct((rows, _LANES), jnp.float32),
        grid=(grid,),
        in_specs=[
            pl.BlockSpec(memory_space=pltpu.MemorySpace.SMEM),  # weight scalar
            pl.BlockSpec(memory_space=pltpu.MemorySpace.SMEM),  # bias scalar
            pl.BlockSpec((blk, _LANES), lambda i: (i, 0)),      # x row block
        ],
        out_specs=pl.BlockSpec((blk, _LANES), lambda i: (i, 0)),
        compiler_params=pltpu.CompilerParams(
            dimension_semantics=("parallel",)),
    )(w, b, x2d)

    if aligned:
        return y2d.reshape(N, 1)                    # metadata-only
    # Discard padded lanes (finite sigmoid(b) garbage) and restore (N, 1).
    return y2d.reshape(-1)[:N].reshape(N, 1)


if __name__ == "__main__":
    key = jax.random.PRNGKey(0)
    k_w, k_b = jax.random.split(key)

    # Input: 200 points in [0, 10], shaped (200, 1) like the module expects.
    N = 200
    x = jnp.linspace(0.0, 10.0, N, dtype=jnp.float32).reshape(N, 1)

    # Deterministic parameter init mimicking nn.Linear(1, 1):
    # uniform(-1/sqrt(in_features), 1/sqrt(in_features)) with in_features=1.
    weight = jax.random.uniform(k_w, (1, 1), jnp.float32, minval=-1.0, maxval=1.0)
    bias = jax.random.uniform(k_b, (1,), jnp.float32, minval=-1.0, maxval=1.0)

    y_ref = jax.nn.sigmoid(x @ weight.T + bias)

    # 1) Default path (small-N XLA fast path).
    y_fast = logistic_regression(x, weight, bias)
    jax.block_until_ready(y_fast)
    assert y_fast.shape == (N, 1)
    assert jnp.allclose(y_fast, y_ref, atol=1e-6), "fast-path mismatch vs reference"

    # 2) Force the Pallas kernel on the ragged N=200 case (exercises the <128 tail path).
    y_kern = logistic_regression(x, weight, bias, min_kernel_elems=0)
    jax.block_until_ready(y_kern)
    assert y_kern.shape == (N, 1)
    assert jnp.allclose(y_kern, y_ref, atol=1e-6), "kernel (ragged) mismatch vs reference"

    # 3) Force the Pallas kernel on a 128-aligned size (zero-copy path, 2-block grid).
    N2 = 2048
    x2 = jnp.linspace(0.0, 10.0, N2, dtype=jnp.float32).reshape(N2, 1)
    y2_ref = jax.nn.sigmoid(x2 @ weight.T + bias)
    y2 = logistic_regression(x2, weight, bias, min_kernel_elems=0)
    jax.block_until_ready(y2)
    assert y2.shape == (N2, 1)
    assert jnp.allclose(y2, y2_ref, atol=1e-6), "kernel (aligned) mismatch vs reference"

    print("KERNEL_OK")
</pallas_src>

<mosaic_0001>
module attributes {stable_mosaic.version = 11 : i64} {
  func.func @logistic_regression_kernel(%arg0: i32, %arg1: memref<1xf32, #tpu.memory_space<smem>>, %arg2: memref<1xf32, #tpu.memory_space<smem>>, %arg3: memref<2x128xf32, #tpu.memory_space<vmem>>, %arg4: memref<2x128xf32, #tpu.memory_space<vmem>>) attributes {dimension_semantics = [#tpu.dimension_semantics<parallel>], iteration_bounds = array<i64: 1>, scalar_prefetch = 0 : i64, scratch_operands = 0 : i64, tpu.core_type = #tpu.core_type<tc>, window_params = [{transform_indices = @transform_0, window_bounds = array<i64: 1>}, {transform_indices = @transform_1, window_bounds = array<i64: 1>}, {transform_indices = @transform_2, window_bounds = array<i64: 2, 128>}, {transform_indices = @transform_3, window_bounds = array<i64: 2, 128>}]} {
    %c0 = arith.constant 0 : index
    %0 = memref.load %arg1[%c0] : memref<1xf32, #tpu.memory_space<smem>>
    %c0_0 = arith.constant 0 : index
    %1 = memref.load %arg2[%c0_0] : memref<1xf32, #tpu.memory_space<smem>>
    %c0_1 = arith.constant 0 : index
    %c0_2 = arith.constant 0 : index
    %2 = vector.load %arg3[%c0_1, %c0_2] : memref<2x128xf32, #tpu.memory_space<vmem>>, vector<2x128xf32>
    %3 = vector.broadcast %0 : f32 to vector<2x128xf32>
    %4 = arith.mulf %2, %3 : vector<2x128xf32>
    %5 = vector.broadcast %1 : f32 to vector<2x128xf32>
    %6 = arith.addf %4, %5 : vector<2x128xf32>
    %7 = arith.negf %6 : vector<2x128xf32>
    %8 = math.exp %7 : vector<2x128xf32>
    %cst = arith.constant 1.000000e+00 : f32
    %9 = vector.broadcast %cst : f32 to vector<2x128xf32>
    %10 = arith.addf %9, %8 : vector<2x128xf32>
    %11 = arith.divf %9, %10 : vector<2x128xf32>
    %c0_3 = arith.constant 0 : index
    %c0_4 = arith.constant 0 : index
    %12 = vector.load %arg4[%c0_3, %c0_4] : memref<2x128xf32, #tpu.memory_space<vmem>>, vector<2x128xf32>
    tpu.vector_store %arg4[%c0_3, %c0_4], %11 {strides = array<i32>} : memref<2x128xf32, #tpu.memory_space<vmem>>, vector<2x128xf32>,
    return
  }
  func.func @transform_0(%arg0: i32) -> i32 {
    %c0_i32 = arith.constant 0 : i32
    %c0_i32_0 = arith.constant 0 : i32
    return %c0_i32 : i32
  }
  func.func @transform_1(%arg0: i32) -> i32 {
    %c0_i32 = arith.constant 0 : i32
    %c0_i32_0 = arith.constant 0 : i32
    return %c0_i32 : i32
  }
  func.func @transform_2(%arg0: i32) -> (i32, i32) {
    %c0_i32 = arith.constant 0 : i32
    %c0_i32_0 = arith.constant 0 : i32
    return %arg0, %c0_i32 : i32, i32
  }
  func.func @transform_3(%arg0: i32) -> (i32, i32) {
    %c0_i32 = arith.constant 0 : i32
    %c0_i32_0 = arith.constant 0 : i32
    return %arg0, %c0_i32 : i32, i32
  }
}

</mosaic_0001>

<bundles_post_ra>
// kernel: tpu_custom_call.1
= control target key start
LH: loop header
LB: loop body
LE: loop exit
PB: predicated region body
PF: predicated region fallthrough
CT: control target
= control target key end

     0   :  { %s106_s0 = inlined_call_operand.<no memory space> [shape: f32[1], index: 0, kind: input, shape index: {}]   ;;  %s107_s1 = inlined_call_operand.<no memory space> [shape: f32[1], index: 1, kind: input, shape index: {}]   ;;  %s108_s2 = inlined_call_operand.vmem [shape: f32[2,128], index: 2, kind: input, shape index: {}]   ;;  %s109_s3 = inlined_call_operand.hbm [shape: f32[2,128], index: 3, kind: output, shape index: {}]  }
   0x1   :  { %v19_v0 = vld [vmem:[%s108_s2] sm:$0x3]  ;;  %v20_v1 = vstv %s106_s0  ;;  %v22_v2 = vstv %s107_s1 }
   0x2   :  { %10 = vsyncpa [#allocation5], 0  ;;  %v21_v3 = vmul.f32 %v20_v1, %v19_v0  ;;  %s73_s18 = smov [#allocation4]  }
   0x3   :  { %s37_s19 = sshll.u32 %s73_s18, 4  ;;  %s38_s19 = int_to_ptr.vmem [resolvable:$true] %s37_s19 }
   0x4   :  { %v23_v4 = vadd.f32 %v22_v2, %v21_v3  ;;  %s51_s2 = scalar_lea.vmem %s38_s19, 32  ;;  %p56_p1 = scmp.lt.s32.totalorder %s38_s19, %s38_s19 }
   0x5   :  { %p52_p0 = scmp.ne.s32.totalorder %s38_s19, %s51_s2  ;;  %p57_p2 = scmp.lt.s32.totalorder %s51_s2, %s51_s2 }
   0x6   :  { %v45_v5 = vmul.f32 -1.442695, %v23_v4 }
   0x7   :  { %p58_p3 = por %p57_p2, %p56_p1 }
   0x8   :  { %47 = vpow2.f32 %v45_v5 }
   0x9   :  { %p59_p4 = pnand %p58_p3, %p52_p0 }
  0x15   :  { %v48_v6 = vpop.eup %47 }
  0x16   :  { %v27_v7 = vadd.f32 1.0, %v48_v6 }
  0x18   :  { %49 = vrcp.f32 %v27_v7 }
  0x25   :  { %v50_v8 = vpop.eup %49 }
  0x26   :  { %30 = vst [vmem:[#allocation4] sm:$0x3] %v50_v8 }
  0x27   :  { %62 = shalt.err (!%p59_p4)
}
  0x28   :  { %40 = dma.vmem_to_hbm [thread:$0]  %s38_s19, 32, %s109_s3, [#allocation5]  }
  0x29   :  { %71 = dma.done.wait [#allocation5], 32  }
  0x2a   :  { %72 = vsyncadd [#allocation5], 4294967264 }
  0x2b   :  { %44 = vsyncpa [#allocation5], 1 }

</bundles_post_ra>
